<compile_context>
chip_gen: v7x
topology: tpu7x:2x2x1
jax: 0.10.0
libtpu: 0.0.40
codegen_flags: <defaults>
</compile_context>

<pallas_src>
import numpy as np
import jax
import jax.numpy as jnp
from jax import lax
from jax.experimental import pallas as pl
from jax.experimental.pallas import tpu as pltpu


EMBED_DIM = 32
NUM_LAYERS = 3
NUM_PUBLIC_IO = 2

STR_VOCAB = list("abcdefghijklmnopqrstuvwxyz0123456789")


# -------------------------- Pallas kernel --------------------------

def bidir_io_kernel(tok_ref, len_ref, emb_ref, w_ref, b_ref,
                    in_agg_ref, out_agg_ref, wm_ref, bm_ref,
                    in_emb_ref, out_emb_ref, merged_ref,
                    h_scr, c_scr):
    """Fused: embedding lookup + 3-layer length-masked LSTM over the combined
    input/output sequence batch + scatter_mean + Linear(2E -> E) merge.

    tok_ref:     [T, N, 1] int32  token ids, N = 2 * B * numPublicIO
    len_ref:     [N, 1]    int32  sequence lengths
    emb_ref:     [Vp, E]   f32    embedding table (rows zero-padded to mult. of 8)
    w_ref:       [L, 2E, 4E] f32  fused [W_ih^T ; W_hh^T] per layer
    b_ref:       [L, 1, 4E]  f32  b_ih + b_hh
    in_agg_ref:  [B, N]    f32    scatter_mean matrix for the input half
    out_agg_ref: [B, N]    f32    scatter_mean matrix for the output half
    wm_ref:      [2E, E]   f32    merge Linear weight (pre-transposed)
    bm_ref:      [1, E]    f32    merge Linear bias
    outputs:     input_embed [B, E], output_embed [B, E], merged [B, E]
    scratch:     h_scr / c_scr [L, N, E]
    """
    T = tok_ref.shape[0]
    N = tok_ref.shape[1]
    Vp = emb_ref.shape[0]
    E = emb_ref.shape[1]
    L = w_ref.shape[0]

    h_scr[...] = jnp.zeros_like(h_scr)
    c_scr[...] = jnp.zeros_like(c_scr)

    # ---- loop-invariant values hoisted out of the time loop ----
    emb_tbl = emb_ref[...]                                   # [Vp, E]
    w_loc = [w_ref[l] for l in range(L)]                     # L x [2E, 4E]
    b_loc = [b_ref[l] for l in range(L)]                     # L x [1, 4E]
    lengths = len_ref[...]                                   # [N, 1] int32
    vocab_iota = lax.broadcasted_iota(jnp.int32, (N, Vp), 1)
    gate_lane = lax.broadcasted_iota(jnp.int32, (N, 4 * E), 1)
    # PyTorch gate order (i, f, g, o): tanh on lanes [2E, 3E), sigmoid elsewhere.
    is_tanh_lane = (gate_lane >= 2 * E) & (gate_lane < 3 * E)

    @pl.loop(0, T)
    def _(t):
        ids = tok_ref[t]                                      # [N, 1] int32
        onehot = (ids == vocab_iota).astype(jnp.float32)      # [N, Vp]
        x_t = jnp.dot(onehot, emb_tbl,
                      preferred_element_type=jnp.float32)     # [N, E]
        valid = lengths > t                                   # [N, 1] bool

        layer_in = x_t
        for l in range(L):                                    # static unroll, L = 3
            h_prev = h_scr[l]
            c_prev = c_scr[l]
            xh = jnp.concatenate([layer_in, h_prev], axis=1)  # [N, 2E]
            gates = jnp.dot(xh, w_loc[l],
                            preferred_element_type=jnp.float32) + b_loc[l]  # [N, 4E]
            act = jnp.where(is_tanh_lane, jnp.tanh(gates), jax.nn.sigmoid(gates))
            i_g = act[:, 0 * E:1 * E]
            f_g = act[:, 1 * E:2 * E]
            g_g = act[:, 2 * E:3 * E]
            o_g = act[:, 3 * E:4 * E]
            c_new = f_g * c_prev + i_g * g_g
            h_new = o_g * jnp.tanh(c_new)
            # freeze state on padded steps (== pack_padded_sequence semantics)
            h_new = jnp.where(valid, h_new, h_prev)
            c_new = jnp.where(valid, c_new, c_prev)
            h_scr[l] = h_new
            c_scr[l] = c_new
            layer_in = h_new

    # ---- epilogue: scatter_mean over numPublicIO + Linear(2E -> E) merge ----
    h_last = h_scr[L - 1]                                     # [N, E]
    in_emb = jnp.dot(in_agg_ref[...], h_last, preferred_element_type=jnp.float32)
    out_emb = jnp.dot(out_agg_ref[...], h_last, preferred_element_type=jnp.float32)
    in_emb_ref[...] = in_emb
    out_emb_ref[...] = out_emb
    # concat([in, out]) @ W  ==  in @ W[:E] + out @ W[E:]
    merged_ref[...] = (jnp.dot(in_emb, wm_ref[0:E, :], preferred_element_type=jnp.float32)
                       + jnp.dot(out_emb, wm_ref[E:2 * E, :], preferred_element_type=jnp.float32)
                       + bm_ref[...])


# -------------------------- wrapper --------------------------

def _vmem_spec():
    return pl.BlockSpec(memory_space=pltpu.MemorySpace.VMEM)


def run_bidir_io_embed(tok, lengths, emb_tbl, w_fused, bias, in_agg, out_agg,
                       w_merge_t, b_merge):
    T, N, _ = tok.shape
    L = w_fused.shape[0]
    E = emb_tbl.shape[1]
    B = in_agg.shape[0]
    out_shapes = (jax.ShapeDtypeStruct((B, E), jnp.float32),
                  jax.ShapeDtypeStruct((B, E), jnp.float32),
                  jax.ShapeDtypeStruct((B, E), jnp.float32))
    return pl.pallas_call(
        bidir_io_kernel,
        out_shape=out_shapes,
        in_specs=[_vmem_spec() for _ in range(9)],
        out_specs=tuple(_vmem_spec() for _ in range(3)),
        scratch_shapes=[pltpu.VMEM((L, N, E), jnp.float32),
                        pltpu.VMEM((L, N, E), jnp.float32)],
    )(tok, lengths, emb_tbl, w_fused, bias, in_agg, out_agg, w_merge_t, b_merge)


# -------------------------- host-side "cooking" glue --------------------------

def build_vocab():
    vocab = {'unk': 0, 'eos': 1}
    for i, c in enumerate(STR_VOCAB):
        vocab[c] = i + 2
    return vocab


def io2idx(vocab, s):
    return [vocab[c] for c in s] + [vocab['eos']]


def cook_raw_io(vocab, inputs_list, outputs_list, num_public_io):
    seq_i, seq_o = [], []
    for inputs, outputs in zip(inputs_list, outputs_list):
        for x, y in zip(inputs[:num_public_io], outputs[:num_public_io]):
            seq_i.append(io2idx(vocab, x))
            seq_o.append(io2idx(vocab, y))
    return seq_i, seq_o


def prepare_batch(vocab, inputs_list, outputs_list, num_public_io):
    """Token ids [T, N, 1], lengths [N, 1] and the scatter_mean matrices, with
    the input sequences in positions [0, B*P) and output sequences in
    [B*P, 2*B*P)."""
    seq_i, seq_o = cook_raw_io(vocab, inputs_list, outputs_list, num_public_io)
    all_seqs = seq_i + seq_o
    B = len(inputs_list)
    P = num_public_io
    NP = len(seq_i)                      # B * P
    N = len(all_seqs)                    # 2 * B * P
    T = max(len(s) for s in all_seqs)
    tok = np.zeros((T, N, 1), dtype=np.int32)
    for j, s in enumerate(all_seqs):
        tok[:len(s), j, 0] = np.asarray(s, dtype=np.int32)
    lengths = np.asarray([[len(s)] for s in all_seqs], dtype=np.int32)
    in_agg = np.zeros((B, N), dtype=np.float32)
    out_agg = np.zeros((B, N), dtype=np.float32)
    for b in range(B):
        in_agg[b, b * P:(b + 1) * P] = 1.0 / P
        out_agg[b, NP + b * P:NP + (b + 1) * P] = 1.0 / P
    return tok, lengths, in_agg, out_agg


def bidir_io_embed_forward(params, inputs_list, outputs_list):
    vocab, emb_tbl, w_fused, bias, w_merge_t, b_merge = params
    tok, lengths, in_agg, out_agg = prepare_batch(
        vocab, inputs_list, outputs_list, NUM_PUBLIC_IO)
    return run_bidir_io_embed(
        jnp.asarray(tok), jnp.asarray(lengths), emb_tbl, w_fused, bias,
        jnp.asarray(in_agg), jnp.asarray(out_agg), w_merge_t, b_merge)


def init_params(key):
    vocab = build_vocab()
    V = len(vocab)
    Vp = ((V + 7) // 8) * 8
    E = EMBED_DIM
    L = NUM_LAYERS
    keys = jax.random.split(key, 8)

    tok_embed = jax.random.normal(keys[0], (V, E), jnp.float32)
    emb_tbl = jnp.zeros((Vp, E), jnp.float32).at[:V].set(tok_embed)

    s = 1.0 / np.sqrt(E)
    w_ih = jax.random.uniform(keys[1], (L, 4 * E, E), jnp.float32, -s, s)
    w_hh = jax.random.uniform(keys[2], (L, 4 * E, E), jnp.float32, -s, s)
    b_ih = jax.random.uniform(keys[3], (L, 4 * E), jnp.float32, -s, s)
    b_hh = jax.random.uniform(keys[4], (L, 4 * E), jnp.float32, -s, s)
    # fused per-layer weight: [x | h] @ [W_ih^T ; W_hh^T]  -> [L, 2E, 4E]
    w_fused = jnp.concatenate([jnp.transpose(w_ih, (0, 2, 1)),
                               jnp.transpose(w_hh, (0, 2, 1))], axis=1)
    bias = (b_ih + b_hh).reshape(L, 1, 4 * E)

    sm = 1.0 / np.sqrt(2 * E)
    w_merge = jax.random.uniform(keys[5], (E, 2 * E), jnp.float32, -sm, sm)
    b_merge = jax.random.uniform(keys[6], (1, E), jnp.float32, -sm, sm)
    w_merge_t = jnp.transpose(w_merge)                 # [2E, E]

    return (vocab, emb_tbl, w_fused, bias, w_merge_t, b_merge)


# -------------------------- pure-numpy reference --------------------------

def reference_forward_np(emb_tbl, w_fused, bias, w_merge_t, b_merge,
                         tok, lengths, in_agg, out_agg):
    T, N, _ = tok.shape
    E = emb_tbl.shape[1]
    L = w_fused.shape[0]
    emb_tbl = np.asarray(emb_tbl, np.float64)
    w_fused = np.asarray(w_fused, np.float64)
    bias = np.asarray(bias, np.float64)
    w_merge_t = np.asarray(w_merge_t, np.float64)
    b_merge = np.asarray(b_merge, np.float64)
    in_agg = np.asarray(in_agg, np.float64)
    out_agg = np.asarray(out_agg, np.float64)

    def sigmoid(z):
        return 1.0 / (1.0 + np.exp(-z))

    h = np.zeros((L, N, E), np.float64)
    c = np.zeros((L, N, E), np.float64)
    for t in range(T):
        x = emb_tbl[tok[t, :, 0]]
        valid = (lengths[:, 0] > t).astype(np.float64)[:, None]
        layer_in = x
        for l in range(L):
            xh = np.concatenate([layer_in, h[l]], axis=1)
            gates = xh @ w_fused[l] + bias[l]
            i_g = sigmoid(gates[:, 0:E])
            f_g = sigmoid(gates[:, E:2 * E])
            g_g = np.tanh(gates[:, 2 * E:3 * E])
            o_g = sigmoid(gates[:, 3 * E:4 * E])
            c_new = f_g * c[l] + i_g * g_g
            h_new = o_g * np.tanh(c_new)
            h[l] = valid * h_new + (1.0 - valid) * h[l]
            c[l] = valid * c_new + (1.0 - valid) * c[l]
            layer_in = h[l]
    h_last = h[L - 1]
    in_emb = in_agg @ h_last
    out_emb = out_agg @ h_last
    merged = in_emb @ w_merge_t[:E] + out_emb @ w_merge_t[E:] + b_merge
    return in_emb, out_emb, merged


if __name__ == "__main__":
    params = init_params(jax.random.PRNGKey(0))

    # B=2 samples, numPublicIO=2 I/O string pairs each.
    inputs_list = [["ab", "cde"], ["hello", "xy"]]
    outputs_list = [["ba", "edc"], ["olleh", "yx"]]

    input_embed, output_embed, merged = bidir_io_embed_forward(
        params, inputs_list, outputs_list)
    jax.block_until_ready((input_embed, output_embed, merged))

    assert input_embed.shape == (2, EMBED_DIM)
    assert output_embed.shape == (2, EMBED_DIM)
    assert merged.shape == (2, EMBED_DIM)

    # numerical sanity check vs. a pure-numpy reference
    vocab, emb_tbl, w_fused, bias, w_merge_t, b_merge = params
    tok, lengths, in_agg, out_agg = prepare_batch(
        vocab, inputs_list, outputs_list, NUM_PUBLIC_IO)
    ref_in, ref_out, ref_m = reference_forward_np(
        np.asarray(emb_tbl), np.asarray(w_fused), np.asarray(bias),
        np.asarray(w_merge_t), np.asarray(b_merge), tok, lengths, in_agg, out_agg)
    np.testing.assert_allclose(np.asarray(input_embed), ref_in, rtol=5e-2, atol=5e-2)
    np.testing.assert_allclose(np.asarray(output_embed), ref_out, rtol=5e-2, atol=5e-2)
    np.testing.assert_allclose(np.asarray(merged), ref_m, rtol=5e-2, atol=5e-2)

    print("KERNEL_OK")
</pallas_src>

<mosaic_0001>
module attributes {stable_mosaic.version = 11 : i64} {
  func.func @bidir_io_kernel(%arg0: memref<6x8x1xi32, #tpu.memory_space<vmem>>, %arg1: memref<8x1xi32, #tpu.memory_space<vmem>>, %arg2: memref<40x32xf32, #tpu.memory_space<vmem>>, %arg3: memref<3x64x128xf32, #tpu.memory_space<vmem>>, %arg4: memref<3x1x128xf32, #tpu.memory_space<vmem>>, %arg5: memref<2x8xf32, #tpu.memory_space<vmem>>, %arg6: memref<2x8xf32, #tpu.memory_space<vmem>>, %arg7: memref<64x32xf32, #tpu.memory_space<vmem>>, %arg8: memref<1x32xf32, #tpu.memory_space<vmem>>, %arg9: memref<2x32xf32, #tpu.memory_space<vmem>>, %arg10: memref<2x32xf32, #tpu.memory_space<vmem>>, %arg11: memref<2x32xf32, #tpu.memory_space<vmem>>, %arg12: memref<3x8x32xf32, #tpu.memory_space<vmem>>, %arg13: memref<3x8x32xf32, #tpu.memory_space<vmem>>) attributes {dimension_semantics = [], scalar_prefetch = 0 : i64, scratch_operands = 2 : i64, tpu.core_type = #tpu.core_type<tc>} {
    %cst = arith.constant 0.000000e+00 : f32
    %0 = vector.broadcast %cst : f32 to vector<3x8x32xf32>
    %c0 = arith.constant 0 : index
    %c0_0 = arith.constant 0 : index
    %c0_1 = arith.constant 0 : index
    %1 = vector.load %arg12[%c0, %c0_0, %c0_1] : memref<3x8x32xf32, #tpu.memory_space<vmem>>, vector<3x8x32xf32>
    tpu.vector_store %arg12[%c0, %c0_0, %c0_1], %0 {strides = array<i32>} : memref<3x8x32xf32, #tpu.memory_space<vmem>>, vector<3x8x32xf32>,
    %cst_2 = arith.constant 0.000000e+00 : f32
    %2 = vector.broadcast %cst_2 : f32 to vector<3x8x32xf32>
    %c0_3 = arith.constant 0 : index
    %c0_4 = arith.constant 0 : index
    %c0_5 = arith.constant 0 : index
    %3 = vector.load %arg13[%c0_3, %c0_4, %c0_5] : memref<3x8x32xf32, #tpu.memory_space<vmem>>, vector<3x8x32xf32>
    tpu.vector_store %arg13[%c0_3, %c0_4, %c0_5], %2 {strides = array<i32>} : memref<3x8x32xf32, #tpu.memory_space<vmem>>, vector<3x8x32xf32>,
    %c0_6 = arith.constant 0 : index
    %c0_7 = arith.constant 0 : index
    %4 = vector.load %arg2[%c0_6, %c0_7] : memref<40x32xf32, #tpu.memory_space<vmem>>, vector<40x32xf32>
    %c0_8 = arith.constant 0 : index
    %c0_9 = arith.constant 0 : index
    %c0_10 = arith.constant 0 : index
    %5 = vector.load %arg3[%c0_8, %c0_9, %c0_10] : memref<3x64x128xf32, #tpu.memory_space<vmem>>, vector<1x64x128xf32>
    %6 = vector.shape_cast %5 : vector<1x64x128xf32> to vector<64x128xf32>
    %c1 = arith.constant 1 : index
    %c0_11 = arith.constant 0 : index
    %c0_12 = arith.constant 0 : index
    %7 = vector.load %arg3[%c1, %c0_11, %c0_12] : memref<3x64x128xf32, #tpu.memory_space<vmem>>, vector<1x64x128xf32>
    %8 = vector.shape_cast %7 : vector<1x64x128xf32> to vector<64x128xf32>
    %c2 = arith.constant 2 : index
    %c0_13 = arith.constant 0 : index
    %c0_14 = arith.constant 0 : index
    %9 = vector.load %arg3[%c2, %c0_13, %c0_14] : memref<3x64x128xf32, #tpu.memory_space<vmem>>, vector<1x64x128xf32>
    %10 = vector.shape_cast %9 : vector<1x64x128xf32> to vector<64x128xf32>
    %c0_15 = arith.constant 0 : index
    %c0_16 = arith.constant 0 : index
    %c0_17 = arith.constant 0 : index
    %11 = vector.load %arg4[%c0_15, %c0_16, %c0_17] : memref<3x1x128xf32, #tpu.memory_space<vmem>>, vector<1x1x128xf32>
    %12 = vector.shape_cast %11 : vector<1x1x128xf32> to vector<1x128xf32>
    %c1_18 = arith.constant 1 : index
    %c0_19 = arith.constant 0 : index
    %c0_20 = arith.constant 0 : index
    %13 = vector.load %arg4[%c1_18, %c0_19, %c0_20] : memref<3x1x128xf32, #tpu.memory_space<vmem>>, vector<1x1x128xf32>
    %14 = vector.shape_cast %13 : vector<1x1x128xf32> to vector<1x128xf32>
    %c2_21 = arith.constant 2 : index
    %c0_22 = arith.constant 0 : index
    %c0_23 = arith.constant 0 : index
    %15 = vector.load %arg4[%c2_21, %c0_22, %c0_23] : memref<3x1x128xf32, #tpu.memory_space<vmem>>, vector<1x1x128xf32>
    %16 = vector.shape_cast %15 : vector<1x1x128xf32> to vector<1x128xf32>
    %c0_24 = arith.constant 0 : index
    %c0_25 = arith.constant 0 : index
    %17 = vector.load %arg1[%c0_24, %c0_25] : memref<8x1xi32, #tpu.memory_space<vmem>>, vector<8x1xi32>
    %18 = tpu.iota {dimensions = array<i32: 1>} : vector<8x40xi32>
    %19 = tpu.iota {dimensions = array<i32: 1>} : vector<8x128xi32>
    %c64_i32 = arith.constant 64 : i32
    %20 = vector.broadcast %c64_i32 : i32 to vector<8x128xi32>
    %21 = arith.cmpi sge, %19, %20 : vector<8x128xi32>
    %c96_i32 = arith.constant 96 : i32
    %22 = vector.broadcast %c96_i32 : i32 to vector<8x128xi32>
    %23 = arith.cmpi slt, %19, %22 : vector<8x128xi32>
    %24 = arith.andi %21, %23 : vector<8x128xi1>
    %c0_i32 = arith.constant 0 : i32
    %c6_i32 = arith.constant 6 : i32
    %25 = arith.addi %c0_i32, %c6_i32 : i32
    %c1_i32 = arith.constant 1 : i32
    scf.for %arg14 = %c0_i32 to %25 step %c1_i32  : i32 {
      %c1_i32_49 = arith.constant 1 : i32
      %43 = arith.muli %arg14, %c1_i32_49 : i32
      %c0_i32_50 = arith.constant 0 : i32
      %44 = arith.addi %c0_i32_50, %43 : i32
      %45 = arith.index_cast %44 : i32 to index
      %c0_51 = arith.constant 0 : index
      %c0_52 = arith.constant 0 : index
      %46 = vector.load %arg0[%45, %c0_51, %c0_52] : memref<6x8x1xi32, #tpu.memory_space<vmem>>, vector<1x8x1xi32>
      %47 = vector.shape_cast %46 : vector<1x8x1xi32> to vector<8x1xi32>
      %48 = vector.broadcast %47 : vector<8x1xi32> to vector<8x40xi32>
      %49 = arith.cmpi eq, %48, %18 : vector<8x40xi32>
      %50 = arith.extui %49 : vector<8x40xi1> to vector<8x40xi32>
      %51 = arith.sitofp %50 : vector<8x40xi32> to vector<8x40xf32>
      %cst_53 = arith.constant dense<0.000000e+00> : vector<8x32xf32>
      %52 = tpu.matmul %51, %4, %cst_53 {dimension_numbers = #tpu.dot_dimension_numbers<[1], [0], [0], [1], [0, 0, 1, 1], [], []>} : vector<8x40xf32>, vector<40x32xf32>, vector<8x32xf32> -> vector<8x32xf32>
      %53 = vector.broadcast %44 : i32 to vector<8x1xi32>
      %54 = arith.cmpi sgt, %17, %53 : vector<8x1xi32>
      %c0_54 = arith.constant 0 : index
      %c0_55 = arith.constant 0 : index
      %c0_56 = arith.constant 0 : index
      %55 = vector.load %arg12[%c0_54, %c0_55, %c0_56] : memref<3x8x32xf32, #tpu.memory_space<vmem>>, vector<1x8x32xf32>
      %56 = vector.shape_cast %55 : vector<1x8x32xf32> to vector<8x32xf32>
      %c0_57 = arith.constant 0 : index
      %c0_58 = arith.constant 0 : index
      %c0_59 = arith.constant 0 : index
      %57 = vector.load %arg13[%c0_57, %c0_58, %c0_59] : memref<3x8x32xf32, #tpu.memory_space<vmem>>, vector<1x8x32xf32>
      %58 = vector.shape_cast %57 : vector<1x8x32xf32> to vector<8x32xf32>
      %59 = tpu.concatenate %52, %56 in 1 : vector<8x32xf32>, vector<8x32xf32> -> vector<8x64xf32>
      %cst_60 = arith.constant dense<0.000000e+00> : vector<8x128xf32>
      %60 = tpu.matmul %59, %6, %cst_60 {dimension_numbers = #tpu.dot_dimension_numbers<[1], [0], [0], [1], [0, 0, 1, 1], [], []>} : vector<8x64xf32>, vector<64x128xf32>, vector<8x128xf32> -> vector<8x128xf32>
      %61 = vector.broadcast %12 : vector<1x128xf32> to vector<8x128xf32>
      %62 = arith.addf %60, %61 : vector<8x128xf32>
      %63 = math.tanh %62 : vector<8x128xf32>
      %64 = arith.negf %62 : vector<8x128xf32>
      %65 = math.exp %64 : vector<8x128xf32>
      %cst_61 = arith.constant 1.000000e+00 : f32
      %66 = vector.broadcast %cst_61 : f32 to vector<8x128xf32>
      %67 = arith.addf %66, %65 : vector<8x128xf32>
      %68 = arith.divf %66, %67 : vector<8x128xf32>
      %69 = arith.select %24, %63, %68 : vector<8x128xi1>, vector<8x128xf32>
      %70 = vector.extract_strided_slice %69 {offsets = [0, 0], sizes = [8, 32], strides = [1, 1]} : vector<8x128xf32> to vector<8x32xf32>
      %71 = vector.extract_strided_slice %69 {offsets = [0, 32], sizes = [8, 32], strides = [1, 1]} : vector<8x128xf32> to vector<8x32xf32>
      %72 = vector.extract_strided_slice %69 {offsets = [0, 64], sizes = [8, 32], strides = [1, 1]} : vector<8x128xf32> to vector<8x32xf32>
      %73 = vector.extract_strided_slice %69 {offsets = [0, 96], sizes = [8, 32], strides = [1, 1]} : vector<8x128xf32> to vector<8x32xf32>
      %74 = arith.mulf %71, %58 : vector<8x32xf32>
      %75 = arith.mulf %70, %72 : vector<8x32xf32>
      %76 = arith.addf %74, %75 : vector<8x32xf32>
      %77 = math.tanh %76 : vector<8x32xf32>
      %78 = arith.mulf %73, %77 : vector<8x32xf32>
      %79 = vector.shape_cast %54 : vector<8x1xi1> to vector<8x1xi1>
      %80 = vector.broadcast %79 : vector<8x1xi1> to vector<8x32xi1>
      %81 = arith.select %80, %78, %56 : vector<8x32xi1>, vector<8x32xf32>
      %82 = vector.shape_cast %54 : vector<8x1xi1> to vector<8x1xi1>
      %83 = vector.broadcast %82 : vector<8x1xi1> to vector<8x32xi1>
      %84 = arith.select %83, %76, %58 : vector<8x32xi1>, vector<8x32xf32>
      %c0_62 = arith.constant 0 : index
      %c0_63 = arith.constant 0 : index
      %c0_64 = arith.constant 0 : index
      %85 = vector.load %arg12[%c0_62, %c0_63, %c0_64] : memref<3x8x32xf32, #tpu.memory_space<vmem>>, vector<1x8x32xf32>
      %86 = vector.shape_cast %85 : vector<1x8x32xf32> to vector<8x32xf32>
      %87 = vector.shape_cast %81 : vector<8x32xf32> to vector<1x8x32xf32>
      tpu.vector_store %arg12[%c0_62, %c0_63, %c0_64], %87 {strides = array<i32>} : memref<3x8x32xf32, #tpu.memory_space<vmem>>, vector<1x8x32xf32>,
      %c0_65 = arith.constant 0 : index
      %c0_66 = arith.constant 0 : index
      %c0_67 = arith.constant 0 : index
      %88 = vector.load %arg13[%c0_65, %c0_66, %c0_67] : memref<3x8x32xf32, #tpu.memory_space<vmem>>, vector<1x8x32xf32>
      %89 = vector.shape_cast %88 : vector<1x8x32xf32> to vector<8x32xf32>
      %90 = vector.shape_cast %84 : vector<8x32xf32> to vector<1x8x32xf32>
      tpu.vector_store %arg13[%c0_65, %c0_66, %c0_67], %90 {strides = array<i32>} : memref<3x8x32xf32, #tpu.memory_space<vmem>>, vector<1x8x32xf32>,
      %c1_68 = arith.constant 1 : index
      %c0_69 = arith.constant 0 : index
      %c0_70 = arith.constant 0 : index
      %91 = vector.load %arg12[%c1_68, %c0_69, %c0_70] : memref<3x8x32xf32, #tpu.memory_space<vmem>>, vector<1x8x32xf32>
      %92 = vector.shape_cast %91 : vector<1x8x32xf32> to vector<8x32xf32>
      %c1_71 = arith.constant 1 : index
      %c0_72 = arith.constant 0 : index
      %c0_73 = arith.constant 0 : index
      %93 = vector.load %arg13[%c1_71, %c0_72, %c0_73] : memref<3x8x32xf32, #tpu.memory_space<vmem>>, vector<1x8x32xf32>
      %94 = vector.shape_cast %93 : vector<1x8x32xf32> to vector<8x32xf32>
      %95 = tpu.concatenate %81, %92 in 1 : vector<8x32xf32>, vector<8x32xf32> -> vector<8x64xf32>
      %cst_74 = arith.constant dense<0.000000e+00> : vector<8x128xf32>
      %96 = tpu.matmul %95, %8, %cst_74 {dimension_numbers = #tpu.dot_dimension_numbers<[1], [0], [0], [1], [0, 0, 1, 1], [], []>} : vector<8x64xf32>, vector<64x128xf32>, vector<8x128xf32> -> vector<8x128xf32>
      %97 = vector.broadcast %14 : vector<1x128xf32> to vector<8x128xf32>
      %98 = arith.addf %96, %97 : vector<8x128xf32>
      %99 = math.tanh %98 : vector<8x128xf32>
      %100 = arith.negf %98 : vector<8x128xf32>
      %101 = math.exp %100 : vector<8x128xf32>
      %cst_75 = arith.constant 1.000000e+00 : f32
      %102 = vector.broadcast %cst_75 : f32 to vector<8x128xf32>
      %103 = arith.addf %102, %101 : vector<8x128xf32>
      %104 = arith.divf %102, %103 : vector<8x128xf32>
      %105 = arith.select %24, %99, %104 : vector<8x128xi1>, vector<8x128xf32>
      %106 = vector.extract_strided_slice %105 {offsets = [0, 0], sizes = [8, 32], strides = [1, 1]} : vector<8x128xf32> to vector<8x32xf32>
      %107 = vector.extract_strided_slice %105 {offsets = [0, 32], sizes = [8, 32], strides = [1, 1]} : vector<8x128xf32> to vector<8x32xf32>
      %108 = vector.extract_strided_slice %105 {offsets = [0, 64], sizes = [8, 32], strides = [1, 1]} : vector<8x128xf32> to vector<8x32xf32>
      %109 = vector.extract_strided_slice %105 {offsets = [0, 96], sizes = [8, 32], strides = [1, 1]} : vector<8x128xf32> to vector<8x32xf32>
      %110 = arith.mulf %107, %94 : vector<8x32xf32>
      %111 = arith.mulf %106, %108 : vector<8x32xf32>
      %112 = arith.addf %110, %111 : vector<8x32xf32>
      %113 = math.tanh %112 : vector<8x32xf32>
      %114 = arith.mulf %109, %113 : vector<8x32xf32>
      %115 = vector.shape_cast %54 : vector<8x1xi1> to vector<8x1xi1>
      %116 = vector.broadcast %115 : vector<8x1xi1> to vector<8x32xi1>
      %117 = arith.select %116, %114, %92 : vector<8x32xi1>, vector<8x32xf32>
      %118 = vector.shape_cast %54 : vector<8x1xi1> to vector<8x1xi1>
      %119 = vector.broadcast %118 : vector<8x1xi1> to vector<8x32xi1>
      %120 = arith.select %119, %112, %94 : vector<8x32xi1>, vector<8x32xf32>
      %c1_76 = arith.constant 1 : index
      %c0_77 = arith.constant 0 : index
      %c0_78 = arith.constant 0 : index
      %121 = vector.load %arg12[%c1_76, %c0_77, %c0_78] : memref<3x8x32xf32, #tpu.memory_space<vmem>>, vector<1x8x32xf32>
      %122 = vector.shape_cast %121 : vector<1x8x32xf32> to vector<8x32xf32>
      %123 = vector.shape_cast %117 : vector<8x32xf32> to vector<1x8x32xf32>
      tpu.vector_store %arg12[%c1_76, %c0_77, %c0_78], %123 {strides = array<i32>} : memref<3x8x32xf32, #tpu.memory_space<vmem>>, vector<1x8x32xf32>,
      %c1_79 = arith.constant 1 : index
      %c0_80 = arith.constant 0 : index
      %c0_81 = arith.constant 0 : index
      %124 = vector.load %arg13[%c1_79, %c0_80, %c0_81] : memref<3x8x32xf32, #tpu.memory_space<vmem>>, vector<1x8x32xf32>
      %125 = vector.shape_cast %124 : vector<1x8x32xf32> to vector<8x32xf32>
      %126 = vector.shape_cast %120 : vector<8x32xf32> to vector<1x8x32xf32>
      tpu.vector_store %arg13[%c1_79, %c0_80, %c0_81], %126 {strides = array<i32>} : memref<3x8x32xf32, #tpu.memory_space<vmem>>, vector<1x8x32xf32>,
      %c2_82 = arith.constant 2 : index
      %c0_83 = arith.constant 0 : index
      %c0_84 = arith.constant 0 : index
      %127 = vector.load %arg12[%c2_82, %c0_83, %c0_84] : memref<3x8x32xf32, #tpu.memory_space<vmem>>, vector<1x8x32xf32>
      %128 = vector.shape_cast %127 : vector<1x8x32xf32> to vector<8x32xf32>
      %c2_85 = arith.constant 2 : index
      %c0_86 = arith.constant 0 : index
      %c0_87 = arith.constant 0 : index
      %129 = vector.load %arg13[%c2_85, %c0_86, %c0_87] : memref<3x8x32xf32, #tpu.memory_space<vmem>>, vector<1x8x32xf32>
      %130 = vector.shape_cast %129 : vector<1x8x32xf32> to vector<8x32xf32>
      %131 = tpu.concatenate %117, %128 in 1 : vector<8x32xf32>, vector<8x32xf32> -> vector<8x64xf32>
      %cst_88 = arith.constant dense<0.000000e+00> : vector<8x128xf32>
      %132 = tpu.matmul %131, %10, %cst_88 {dimension_numbers = #tpu.dot_dimension_numbers<[1], [0], [0], [1], [0, 0, 1, 1], [], []>} : vector<8x64xf32>, vector<64x128xf32>, vector<8x128xf32> -> vector<8x128xf32>
      %133 = vector.broadcast %16 : vector<1x128xf32> to vector<8x128xf32>
      %134 = arith.addf %132, %133 : vector<8x128xf32>
      %135 = math.tanh %134 : vector<8x128xf32>
      %136 = arith.negf %134 : vector<8x128xf32>
      %137 = math.exp %136 : vector<8x128xf32>
      %cst_89 = arith.constant 1.000000e+00 : f32
      %138 = vector.broadcast %cst_89 : f32 to vector<8x128xf32>
      %139 = arith.addf %138, %137 : vector<8x128xf32>
      %140 = arith.divf %138, %139 : vector<8x128xf32>
      %141 = arith.select %24, %135, %140 : vector<8x128xi1>, vector<8x128xf32>
      %142 = vector.extract_strided_slice %141 {offsets = [0, 0], sizes = [8, 32], strides = [1, 1]} : vector<8x128xf32> to vector<8x32xf32>
      %143 = vector.extract_strided_slice %141 {offsets = [0, 32], sizes = [8, 32], strides = [1, 1]} : vector<8x128xf32> to vector<8x32xf32>
      %144 = vector.extract_strided_slice %141 {offsets = [0, 64], sizes = [8, 32], strides = [1, 1]} : vector<8x128xf32> to vector<8x32xf32>
      %145 = vector.extract_strided_slice %141 {offsets = [0, 96], sizes = [8, 32], strides = [1, 1]} : vector<8x128xf32> to vector<8x32xf32>
      %146 = arith.mulf %143, %130 : vector<8x32xf32>
      %147 = arith.mulf %142, %144 : vector<8x32xf32>
      %148 = arith.addf %146, %147 : vector<8x32xf32>
      %149 = math.tanh %148 : vector<8x32xf32>
      %150 = arith.mulf %145, %149 : vector<8x32xf32>
      %151 = vector.shape_cast %54 : vector<8x1xi1> to vector<8x1xi1>
      %152 = vector.broadcast %151 : vector<8x1xi1> to vector<8x32xi1>
      %153 = arith.select %152, %150, %128 : vector<8x32xi1>, vector<8x32xf32>
      %154 = vector.shape_cast %54 : vector<8x1xi1> to vector<8x1xi1>
      %155 = vector.broadcast %154 : vector<8x1xi1> to vector<8x32xi1>
      %156 = arith.select %155, %148, %130 : vector<8x32xi1>, vector<8x32xf32>
      %c2_90 = arith.constant 2 : index
      %c0_91 = arith.constant 0 : index
      %c0_92 = arith.constant 0 : index
      %157 = vector.load %arg12[%c2_90, %c0_91, %c0_92] : memref<3x8x32xf32, #tpu.memory_space<vmem>>, vector<1x8x32xf32>
      %158 = vector.shape_cast %157 : vector<1x8x32xf32> to vector<8x32xf32>
      %159 = vector.shape_cast %153 : vector<8x32xf32> to vector<1x8x32xf32>
      tpu.vector_store %arg12[%c2_90, %c0_91, %c0_92], %159 {strides = array<i32>} : memref<3x8x32xf32, #tpu.memory_space<vmem>>, vector<1x8x32xf32>,
      %c2_93 = arith.constant 2 : index
      %c0_94 = arith.constant 0 : index
      %c0_95 = arith.constant 0 : index
      %160 = vector.load %arg13[%c2_93, %c0_94, %c0_95] : memref<3x8x32xf32, #tpu.memory_space<vmem>>, vector<1x8x32xf32>
      %161 = vector.shape_cast %160 : vector<1x8x32xf32> to vector<8x32xf32>
      %162 = vector.shape_cast %156 : vector<8x32xf32> to vector<1x8x32xf32>
      tpu.vector_store %arg13[%c2_93, %c0_94, %c0_95], %162 {strides = array<i32>} : memref<3x8x32xf32, #tpu.memory_space<vmem>>, vector<1x8x32xf32>,
    }
    %c6_i32_26 = arith.constant 6 : i32
    %c2_27 = arith.constant 2 : index
    %c0_28 = arith.constant 0 : index
    %c0_29 = arith.constant 0 : index
    %26 = vector.load %arg12[%c2_27, %c0_28, %c0_29] : memref<3x8x32xf32, #tpu.memory_space<vmem>>, vector<1x8x32xf32>
    %27 = vector.shape_cast %26 : vector<1x8x32xf32> to vector<8x32xf32>
    %c0_30 = arith.constant 0 : index
    %c0_31 = arith.constant 0 : index
    %28 = vector.load %arg5[%c0_30, %c0_31] : memref<2x8xf32, #tpu.memory_space<vmem>>, vector<2x8xf32>
    %cst_32 = arith.constant dense<0.000000e+00> : vector<2x32xf32>
    %29 = tpu.matmul %28, %27, %cst_32 {dimension_numbers = #tpu.dot_dimension_numbers<[1], [0], [0], [1], [0, 0, 1, 1], [], []>} : vector<2x8xf32>, vector<8x32xf32>, vector<2x32xf32> -> vector<2x32xf32>
    %c0_33 = arith.constant 0 : index
    %c0_34 = arith.constant 0 : index
    %30 = vector.load %arg6[%c0_33, %c0_34] : memref<2x8xf32, #tpu.memory_space<vmem>>, vector<2x8xf32>
    %cst_35 = arith.constant dense<0.000000e+00> : vector<2x32xf32>
    %31 = tpu.matmul %30, %27, %cst_35 {dimension_numbers = #tpu.dot_dimension_numbers<[1], [0], [0], [1], [0, 0, 1, 1], [], []>} : vector<2x8xf32>, vector<8x32xf32>, vector<2x32xf32> -> vector<2x32xf32>
    %c0_36 = arith.constant 0 : index
    %c0_37 = arith.constant 0 : index
    %32 = vector.load %arg9[%c0_36, %c0_37] : memref<2x32xf32, #tpu.memory_space<vmem>>, vector<2x32xf32>
    tpu.vector_store %arg9[%c0_36, %c0_37], %29 {strides = array<i32>} : memref<2x32xf32, #tpu.memory_space<vmem>>, vector<2x32xf32>,
    %c0_38 = arith.constant 0 : index
    %c0_39 = arith.constant 0 : index
    %33 = vector.load %arg10[%c0_38, %c0_39] : memref<2x32xf32, #tpu.memory_space<vmem>>, vector<2x32xf32>
    tpu.vector_store %arg10[%c0_38, %c0_39], %31 {strides = array<i32>} : memref<2x32xf32, #tpu.memory_space<vmem>>, vector<2x32xf32>,
    %c0_40 = arith.constant 0 : index
    %c0_41 = arith.constant 0 : index
    %34 = vector.load %arg7[%c0_40, %c0_41] : memref<64x32xf32, #tpu.memory_space<vmem>>, vector<32x32xf32>
    %cst_42 = arith.constant dense<0.000000e+00> : vector<2x32xf32>
    %35 = tpu.matmul %29, %34, %cst_42 {dimension_numbers = #tpu.dot_dimension_numbers<[1], [0], [0], [1], [0, 0, 1, 1], [], []>} : vector<2x32xf32>, vector<32x32xf32>, vector<2x32xf32> -> vector<2x32xf32>
    %c32 = arith.constant 32 : index
    %c0_43 = arith.constant 0 : index
    %36 = vector.load %arg7[%c32, %c0_43] : memref<64x32xf32, #tpu.memory_space<vmem>>, vector<32x32xf32>
    %cst_44 = arith.constant dense<0.000000e+00> : vector<2x32xf32>
    %37 = tpu.matmul %31, %36, %cst_44 {dimension_numbers = #tpu.dot_dimension_numbers<[1], [0], [0], [1], [0, 0, 1, 1], [], []>} : vector<2x32xf32>, vector<32x32xf32>, vector<2x32xf32> -> vector<2x32xf32>
    %38 = arith.addf %35, %37 : vector<2x32xf32>
    %c0_45 = arith.constant 0 : index
    %c0_46 = arith.constant 0 : index
    %39 = vector.load %arg8[%c0_45, %c0_46] : memref<1x32xf32, #tpu.memory_space<vmem>>, vector<1x32xf32>
    %40 = vector.broadcast %39 : vector<1x32xf32> to vector<2x32xf32>
    %41 = arith.addf %38, %40 : vector<2x32xf32>
    %c0_47 = arith.constant 0 : index
    %c0_48 = arith.constant 0 : index
    %42 = vector.load %arg11[%c0_47, %c0_48] : memref<2x32xf32, #tpu.memory_space<vmem>>, vector<2x32xf32>
    tpu.vector_store %arg11[%c0_47, %c0_48], %41 {strides = array<i32>} : memref<2x32xf32, #tpu.memory_space<vmem>>, vector<2x32xf32>,
    return
  }
}

</mosaic_0001>

<bundles_post_ra>
// kernel: tpu_custom_call.1
= control target key start
LH: loop header
LB: loop body
LE: loop exit
PB: predicated region body
PF: predicated region fallthrough
CT: control target
= control target key end

     0   :  { %17 = vsyncpa [#allocation5], 0  ;;  %s1780_s0 = inlined_call_operand.vmem [shape: s32[6,8,1], index: 0, kind: input, shape index: {}]   ;;  %s1781_s1 = inlined_call_operand.vmem [shape: s32[8,1], index: 1, kind: input, shape index: {}]   ;;  %s1782_s2 = inlined_call_operand.vmem [shape: f32[40,32], index: 2, kind: input, shape index: {}]   ;;  %s1783_s3 = inlined_call_operand.vmem [shape: f32[3,64,128], index: 3, kind: input, shape index: {}]   ;;  %s1784_s4 = inlined_call_operand.vmem [shape: f32[3,1,128], index: 4, kind: input, shape index: {}]   ;;  %s1785_s5 = inlined_call_operand.vmem [shape: f32[2,8], index: 5, kind: input, shape index: {}]   ;;  %s1786_s6 = inlined_call_operand.vmem [shape: f32[2,8], index: 6, kind: input, shape index: {}]   ;;  %s1787_s7 = inlined_call_operand.vmem [shape: f32[64,32], index: 7, kind: input, shape index: {}]   ;;  %s1788_s8 = inlined_call_operand.vmem [shape: f32[1,32], index: 8, kind: input, shape index: {}]   ;;  %s1789_s9 = inlined_call_operand.hbm [shape: f32[2,32], index: 9, kind: output, shape index: {0}]   ;;  %s1790_s10 = inlined_call_operand.hbm [shape: f32[2,32], index: 10, kind: output, shape index: {1}]   ;;  %s1791_s11 = inlined_call_operand.hbm [shape: f32[2,32], index: 11, kind: output, shape index: {2}]  }
   0x1   :  { %18 = vsyncpa [#allocation7], 0  ;;  %vm37_vm0 = vcmask 261120   ;;  %v1381_v0 = vld [vmem:[%s1782_s2] sm:$0xff]  ;;  %v1386_v1 = vld [vmem:[%s1782_s2 + $0x8] sm:$0xff]  ;;  %v81_v2 = vlaneseq  ;;  %v1305_v3 = vmov 0.0  }
   0x2   :  { %38 = vst.msk [vmem:[#allocation2] sm:$0xff] %vm37_vm0, %v1305_v3  ;;  %39 = vst.msk [vmem:[#allocation2 + $0x8] sm:$0xff] %vm37_vm0, %v1305_v3  ;;  %v1403_v4 = vld [vmem:[%s1782_s2 + $0x10] sm:$0xff]  ;;  %v1408_v5 = vld [vmem:[%s1782_s2 + $0x18] sm:$0xff] }
   0x3   :  { %40 = vst.msk [vmem:[#allocation2 + $0x10] sm:$0xff] %vm37_vm0, %v1305_v3  ;;  %41 = vst.msk [vmem:[#allocation3] sm:$0xff] %vm37_vm0, %v1305_v3  ;;  %v1413_v6 = vld [vmem:[%s1782_s2 + $0x20] sm:$0xff]  ;;  %v1423_v8 = vld [vmem:[%s1783_s3 + $0x8] sm:$0xff]  ;;  %v1460_v16 = vand.u32 127, %v81_v2 }
   0x4   :  { %42 = vst.msk [vmem:[#allocation3 + $0x8] sm:$0xff] %vm37_vm0, %v1305_v3  ;;  %43 = vst.msk [vmem:[#allocation3 + $0x10] sm:$0xff] %vm37_vm0, %v1305_v3  ;;  %v1418_v7 = vld [vmem:[%s1783_s3] sm:$0xff]  ;;  %v1428_v9 = vld [vmem:[%s1783_s3 + $0x10] sm:$0xff] }
   0x5   :  { %v1433_v10 = vld [vmem:[%s1783_s3 + $0x18] sm:$0xff]  ;;  %v1438_v11 = vld [vmem:[%s1783_s3 + $0x20] sm:$0xff]  ;;  %v1443_v12 = vld [vmem:[%s1783_s3 + $0x28] sm:$0xff]  ;;  %vm83_vm1 = vcmp.ge.s32.totalorder %v1460_v16, 64  ;;  %vm84_vm2 = vcmp.lt.s32.totalorder %v1460_v16, 96 }
   0x6   :  { %v1448_v13 = vld [vmem:[%s1783_s3 + $0x30] sm:$0xff]  ;;  %v1453_v14 = vld [vmem:[%s1783_s3 + $0x38] sm:$0xff]  ;;  %v1458_v15 = vld [vmem:[%s1783_s3 + $0x40] sm:$0xff] }
   0x7   :  { %v1465_v17 = vld [vmem:[%s1783_s3 + $0x48] sm:$0xff]  ;;  %v1470_v18 = vld [vmem:[%s1783_s3 + $0x50] sm:$0xff]  ;;  %v1475_v19 = vld [vmem:[%s1783_s3 + $0x58] sm:$0xff] }
   0x8   :  { %v1480_v20 = vld [vmem:[%s1783_s3 + $0x60] sm:$0xff]  ;;  %v1485_v21 = vld [vmem:[%s1783_s3 + $0x68] sm:$0xff]  ;;  %v1490_v22 = vld [vmem:[%s1783_s3 + $0x70] sm:$0xff] }
   0x9   :  { %v1495_v23 = vld [vmem:[%s1783_s3 + $0x78] sm:$0xff]  ;;  %v1500_v24 = vld [vmem:[%s1783_s3 + $0x80] sm:$0xff]  ;;  %v1505_v25 = vld [vmem:[%s1783_s3 + $0x88] sm:$0xff] }
   0xa   :  { %v1510_v26 = vld [vmem:[%s1783_s3 + $0x90] sm:$0xff]  ;;  %v1515_v27 = vld [vmem:[%s1783_s3 + $0x98] sm:$0xff]  ;;  %v1520_v28 = vld [vmem:[%s1783_s3 + $0xa0] sm:$0xff] }
   0xb   :  { %v1527_v29 = vld [vmem:[%s1783_s3 + $0xa8] sm:$0xff]  ;;  %v1532_v30 = vld [vmem:[%s1783_s3 + $0xb0] sm:$0xff]  ;;  %v1537_v31 = vld [vmem:[%s1783_s3 + $0xb8] sm:$0xff]  ;;  %s1563_s3 = smov 0  }
   0xc   :  { %v1542_v32 = vld [vmem:[%s1784_s4] ss:$0 sm:$0xff]  ;;  %v1547_v33 = vld [vmem:[%s1784_s4 + $0x1] ss:$0 sm:$0xff]  ;;  %v1552_v34 = vld [vmem:[%s1784_s4 + $0x2] ss:$0 sm:$0xff] }
   0xd   :  { %v1557_v35 = vld [vmem:[%s1781_s1] sm:$0xff]  ;;  %vm1559_vm3 = vmand %vm83_vm1, %vm84_vm2 }
   0xe LB: > { %v1127_v37 = vpack.c.bf16 %v1386_v1, %v1381_v0  ;;  %v1306_v38 = vmov 0   ;;  %v1307_v39 = vmov 0.0|0.0   ;;  %s960_s1 = sshll.u32 %s1303_s3, 3  ;;  %v1130_v40 = vpack.c.bf16 %v1408_v5, %v1403_v4  ;;  %v177_v43 = vld [vmem:[#allocation2] sm:$0xff]  ;;  %s1310_s25 = smov 32   ;;  %v178_v2 = vld [vmem:[#allocation3] sm:$0xff]  ;;  %s1303_s3 = sphi %s1563_s3, %s91_s3  }
   0xf   : > { %1201 = vset.pattern.permute.xlu0 %v1306_v38  ;;  %1126 = vmatprep.subr.bf16.mxu0 %v1307_v39  ;;  %s93_s24 = scalar_lea.vmem %s1780_s0, %s960_s1  ;;  %vm1308_vm4 = vmmov 0   ;;  %v1309_v42 = vmov 0.0   ;;  %v1133_v44 = vpack.c.bf16 %v1423_v8, %v1418_v7  ;;  %v1136_v45 = vpack.c.bf16 %v1433_v10, %v1428_v9  ;;  %s1311_s26 = smov 64  }
  0x10   : > { %1128 = vmatpush3.bf16.msra.mxu0 %v1127_v37  ;;  %1132 = vmatprep.subr.bf16.mxu1 %v1307_v39  ;;  %v94_v41 = vld [vmem:[%s93_s24] sm:$0xff]  ;;  %v1139_v46 = vpack.c.bf16 %v1443_v12, %v1438_v11  ;;  %v1142_v47 = vpack.c.bf16 %v1453_v14, %v1448_v13  ;;  %vm101_vm5 = vcmask 326656   ;;  %vm190_vm7 = vcmask 523264   ;;  %s1312_s27 = smov 96  }
  0x11   : > { %1129 = vmatprep.subr.bf16.mxu0 %v1307_v39  ;;  %1202 = vset.pattern.permute.xlu1 %v1306_v38  ;;  %v175_v63 = vstv %s1303_s3  ;;  %s91_s3 = sadd.s32 1, %s1303_s3  }
  0x12   : > { %96 = vperm.xlu0 %1201, %v94_v41   ;;  %1034 = vmatprep.mubr.msk.f32.mxu0 %vm1308_vm4, %v1309_v42  ;;  %vm176_vm8 = vcmp.gt.s32.totalorder %v1557_v35, %v175_v63  ;;  %p88_p0 = scmp.ge.s32.totalorder %s91_s3, 6  }
  0x13   : > { %1053 = vmatprep.mubr.msk.f32.mxu1 %vm1308_vm4, %v1309_v42  ;;  %1134 = vmatpush3.bf16.msra.mxu1 %v1133_v44  ;;  %v293_v37 = vsel %vm176_vm8, 1, %v1306_v38  ;;  %v1145_v38 = vpack.c.bf16 %v1465_v17, %v1458_v15  ;;  %vm580_vm10 = vcmask (%p88_p0), 64512   ;;  %vm1313_vm11 = vmmov (%p88_p0), 0   ;;  %v735_v0 = vld [vmem:[%s1787_s7 + $0x20] sm:$0xff] (%p88_p0)  ;;  %v736_v1 = vld [vmem:[%s1787_s7 + $0x28] sm:$0xff] (%p88_p0)  ;;  %v737_v7 = vld [vmem:[%s1787_s7 + $0x30] sm:$0xff] (%p88_p0) }
  0x14   : > { %1131 = vmatpush3.bf16.msra.mxu0 %v1130_v40  ;;  %1135 = vmatprep.subr.bf16.mxu1 %v1307_v39  ;;  %v1169_v4 = vpack.c.bf16 (%p88_p0), %v736_v1, %v735_v0  ;;  %v731_v5 = vld [vmem:[%s1787_s7] sm:$0xff] (%p88_p0)  ;;  %v738_v9 = vld [vmem:[%s1787_s7 + $0x38] sm:$0xff] (%p88_p0)  ;;  %v733_v10 = vld [vmem:[%s1787_s7 + $0x10] sm:$0xff] (%p88_p0)  ;;  %v1314_v12 = vmov (%p88_p0), 0.0|0.0   ;;  %vm728_vm12 = vcmask (%p88_p0), 254976   ;;  %s1316_s23 = smov (%p88_p0), [#allocation4]  }
  0x15   : > { %1032 = vmatprep.subr.mxu0 %v1309_v42  ;;  %v734_v11 = vld [vmem:[%s1787_s7 + $0x18] sm:$0xff] (%p88_p0)  ;;  %v1172_v13 = vpack.c.bf16 (%p88_p0), %v738_v9, %v737_v7  ;;  %s900_s24 = sshll.u32 (%p88_p0), %s1316_s23, 4  ;;  %s901_s24 = int_to_ptr.vmem [resolvable:$true] %s900_s24 }
  0x16   : > { %180 = vrot.lane.b32.xlu0 %v177_v43, %s1310_s25  ;;  %v1178_v14 = vpack.c.bf16 (%p88_p0), %v734_v11, %v733_v10 }
  0x17   : > { %1137 = vmatpush3.bf16.msra.mxu1 %v1136_v45 }
  0x18   : > { %1033 = vmatpush3.msra.mxu0 %v1413_v6  ;;  %1138 = vmatprep.subr.bf16.mxu1 %v1307_v39  ;;  %v732_v6 = vld [vmem:[%s1787_s7 + $0x8] sm:$0xff] (%p88_p0)  ;;  %s1315_s7 = smov (%p88_p0), [#allocation6]  }
  0x19   : > { %1144 = vmatprep.subr.bf16.mxu0 %v1307_v39  ;;  %v1175_v8 = vpack.c.bf16 (%p88_p0), %v732_v6, %v731_v5  ;;  %s910_s4 = sshll.u32 (%p88_p0), %s1315_s7, 4  ;;  %s911_s4 = int_to_ptr.vmem [resolvable:$true] %s910_s4 }
  0x1a   :  { %p1232_p2 = scmp.lt.s32.totalorder (%p88_p0), %s911_s4, %s911_s4 }
  0x1b   : > { %1140 = vmatpush3.bf16.msra.mxu1 %v1139_v46 }
  0x1c   : > { %1141 = vmatprep.subr.bf16.mxu1 %v1307_v39 }
  0x1f   : > { %1143 = vmatpush3.bf16.msra.mxu1 %v1142_v47  ;;  %v314_v47 = vld [vmem:[#allocation2 + $0x8] sm:$0xff] }
  0x20   : > { %1156 = vmatprep.subr.bf16.mxu1 %v1307_v39 }
  0x91   : > { %v97_v48 = vpop.permute.xlu0 %96 }
  0x92   : > { %vm98_vm6 = vcmp.eq.s32.totalorder %v97_v48, %v1460_v16  ;;  %v1148_v48 = vpack.c.bf16 %v1475_v19, %v1470_v18 }
  0x93   : > { %v961_v49 = vsel %vm98_vm6, 1.0, %v1309_v42 }
  0x94   : > { %1035 = vmatmul.mubr.msk.f32.vlgmr.msra.gmra.mrb[0].mxu0 %vm101_vm5, %v961_v49 }
  0x95   : > { %1072 = vmatprep.mubr.msk.f32.mxu0 %vm1308_vm4, %v1309_v42  ;;  %v181_v50 = vpop.permute.xlu0 %180  ;;  %1146 = vmatpush3.bf16.msra.mxu0 %v1145_v38 }
  0x96   : > { %1147 = vmatprep.subr.bf16.mxu0 %v1307_v39 }
  0x99   : > { %1149 = vmatpush3.bf16.msra.mxu0 %v1148_v48 }
  0x9a   : > { %1150 = vmatprep.subr.bf16.mxu0 %v1307_v39 }
 0x167   : > { %v171_v51 = vpop.f32.mrb[0].mxu0 }
 0x168   : > { %v183_v52 = vsel %vm37_vm0, %v171_v51, %v181_v50  ;;  %v1036_v53 = vpop.f32.mrb[1].mxu0  ;;  %v1154_v50 = vpack.c.bf16 %v1495_v23, %v1490_v22  ;;  %v316_v51 = vld [vmem:[#allocation3 + $0x8] sm:$0xff] }
 0x169   : > { %1054 = vmatmul.mubr.msk.f32.vlgmr.msra.gmra.mrb[0].mxu1 %vm190_vm7, %v183_v52 }
 0x16a   : > { %1091 = vmatprep.mubr.msk.f32.mxu1 %vm1308_vm4, %v1309_v42 }
 0x23c   : > { %v260_v54 = vpop.f32.mrb[0].mxu1 }
 0x23d   : > { %v261_v55 = vadd.f32 %v1542_v32, %v260_v54  ;;  %v1055_v56 = vpop.f32.mrb[1].mxu1 }
 0x23f   : > { %v965_v57 = vmul.f32 -1.442695, %v261_v55 }
 0x241   : > { %1203 = vpow2.f32 %v965_v57 }
 0x242   : > { %1205 = vtanh.f32 %v261_v55 }
 0x24b   : > { %v1204_v58 = vpop.eup %1203 }
 0x24c   : > { %v268_v59 = vadd.f32 1.0, %v1204_v58  ;;  %v1206_v60 = vpop.eup %1205 }
 0x24e   : > { %1207 = vrcp.f32 %v268_v59 }
 0x258   : > { %v1208_v61 = vpop.eup %1207 }
 0x259   : > { %v271_v62 = vsel %vm1559_vm3, %v1206_v60, %v1208_v61 }
 0x25a   : > { %278 = vrot.lane.b32.xlu1 %v271_v62, %s1311_s26 }
 0x25e   : > { %273 = vrot.lane.b32.xlu1 %v178_v2, %s1310_s25 }
 0x262   : > { %295 = vperm.xlu1 %1202, %v293_v37  }
 0x266   : > { %298 = vrot.lane.b32.xlu1 %v177_v43, %s1312_s27  ;;  %v1151_v43 = vpack.c.bf16 %v1485_v21, %v1480_v20 }
 0x268   : > { %1152 = vmatpush3.bf16.msra.mxu0 %v1151_v43 }
 0x269   : > { %1153 = vmatprep.subr.bf16.mxu0 %v1307_v39 }
 0x26a   : > { %318 = vrot.lane.b32.xlu1 %v314_v47, %s1310_s25 }
 0x26c   : > { %1155 = vmatpush3.bf16.msra.mxu0 %v1154_v50 }
 0x26d   :  { %1094 = vmatprep.subr.mxu0 (%p88_p0), %v1305_v3 }
 0x26e   : > { %410 = vrot.lane.b32.xlu1 %v316_v51, %s1310_s25  ;;  %v446_v51 = vld [vmem:[#allocation2 + $0x10] sm:$0xff] }
 0x2cc   : > { %v279_v40 = vpop.permute.xlu1 %278 }
 0x2cd   : > { %v281_v41 = vmul.f32 %v279_v40, %v271_v62 }
 0x2cf   : > { %283 = vrot.lane.b32.xlu0 %v281_v41, %s1310_s25 }
 0x2d0   : > { %v1613_v42 = vpop.permute.xlu1 %273 }
 0x2d1   : > { %v276_v44 = vmul.f32 %v1613_v42, %v271_v62 }
 0x2e1   : > { %v1633_v52 = vpop.permute.xlu1 %295 }
 0x2e2   : > { %vm297_vm9 = vcmp.eq.s32.totalorder %v1633_v52, 1  ;;  %v654_v52 = vld [vmem:[%s1786_s6] sm:$0x3] (%p88_p0) }
 0x2e5   : > { %v299_v54 = vpop.permute.xlu1 %298 }
 0x2e9   : > { %v319_v57 = vpop.permute.xlu1 %318 }
 0x2ed   : > { %v411_v48 = vpop.permute.xlu1 %410 }
 0x341   : > { %v284_v45 = vpop.permute.xlu0 %283 }
 0x342   : > { %v1616_v46 = vadd.f32 %v284_v45, %v276_v44 }
 0x344   : > { %1209 = vtanh.f32 %v1616_v46 }
 0x34e   : > { %v1210_v49 = vpop.eup %1209 }
 0x34f   : > { %289 = vrot.lane.b32.xlu0 %v1210_v49, %s1311_s26 }
 0x3c1   : > { %v290_v53 = vpop.permute.xlu0 %289 }
 0x3c2   : > { %v292_v55 = vmul.f32 %v290_v53, %v271_v62  ;;  %v1157_v53 = vpack.c.bf16 %v1505_v25, %v1500_v24 }
 0x3c4   : > { %v301_v56 = vsel %vm297_vm9, %v292_v55, %v299_v54  ;;  %1158 = vmatpush3.bf16.msra.mxu1 %v1157_v53  ;;  %v1160_v54 = vpack.c.bf16 %v1515_v27, %v1510_v26 }
 0x3c5   : > { %304 = vrot.lane.b32.xlu0 %v301_v56, %s1310_s25  ;;  %1159 = vmatprep.subr.bf16.mxu1 %v1307_v39  ;;  %v1166_v56 = vpack.c.bf16 %v1537_v31, %v1532_v30 }
 0x3c8   : > { %1161 = vmatpush3.bf16.msra.mxu1 %v1160_v54 }
 0x3c9   : > { %1162 = vmatprep.subr.bf16.mxu1 %v1307_v39 }
 0x437   : > { %v305_v58 = vpop.permute.xlu0 %304 }
 0x438   : > { %307 = vst.msk [vmem:[#allocation2] sm:$0xff] %vm37_vm0, %v305_v58  ;;  %v321_v59 = vsel %vm37_vm0, %v305_v58, %v319_v57  ;;  %v448_v57 = vld [vmem:[#allocation3 + $0x10] sm:$0xff] }
 0x439   : > { %1073 = vmatmul.mubr.msk.f32.vlgmr.msra.gmra.mrb[2].mxu0 %vm190_vm7, %v321_v59 }
 0x43a   :  { %1096 = vmatprep.mubr.msk.f32.mxu0 (%p88_p0), %vm1313_vm11, %v1305_v3 }
 0x50c   : > { %v397_v60 = vpop.f32.mrb[2].mxu0 }
 0x50d   : > { %v398_v61 = vadd.f32 %v1547_v33, %v397_v60  ;;  %v1074_v63 = vpop.f32.mrb[3].mxu0 }
 0x50f   : > { %v968_v62 = vmul.f32 -1.442695, %v398_v61 }
 0x511   : > { %1211 = vpow2.f32 %v968_v62 }
 0x512   : > { %1213 = vtanh.f32 %v398_v61 }
 0x51b   : > { %v1212_v2 = vpop.eup %1211 }
 0x51c   : > { %v405_v37 = vadd.f32 1.0, %v1212_v2  ;;  %v1214_v40 = vpop.eup %1213 }
 0x51e   : > { %1215 = vrcp.f32 %v405_v37 }
 0x528   : > { %v1216_v41 = vpop.eup %1215 }
 0x529   : > { %v408_v44 = vsel %vm1559_vm3, %v1214_v40, %v1216_v41 }
 0x52a   : > { %415 = vrot.lane.b32.xlu0 %v408_v44, %s1311_s26  ;;  %v413_v43 = vmul.f32 %v411_v48, %v408_v44 }
 0x59c   : > { %v416_v45 = vpop.permute.xlu0 %415 }
 0x59d   : > { %v418_v38 = vmul.f32 %v416_v45, %v408_v44 }
 0x59f   : > { %420 = vrot.lane.b32.xlu0 %v418_v38, %s1310_s25 }
 0x5a3   : > { %430 = vrot.lane.b32.xlu0 %v314_v47, %s1312_s27  ;;  %v1163_v47 = vpack.c.bf16 %v1527_v29, %v1520_v28 }
 0x5a5   : > { %1164 = vmatpush3.bf16.msra.mxu1 %v1163_v47 }
 0x5a6   : > { %1165 = vmatprep.subr.bf16.mxu1 %v1307_v39 }
 0x5a7   : > { %450 = vrot.lane.b32.xlu0 %v446_v51, %s1310_s25 }
 0x5a9   : > { %1167 = vmatpush3.bf16.msra.mxu1 %v1166_v56 }
 0x5aa   :  { %1099 = vmatprep.subr.mxu1 (%p88_p0), %v1305_v3 }
 0x5ab   : > { %542 = vrot.lane.b32.xlu0 %v448_v57, %s1310_s25 }
 0x611   : > { %v421_v49 = vpop.permute.xlu0 %420 }
 0x612   : > { %v423_v50 = vadd.f32 %v421_v49, %v413_v43 }
 0x614   : > { %1217 = vtanh.f32 %v423_v50  ;;  %v434_v47 = vsel %vm297_vm9, %v423_v50, %v411_v48  ;;  %v302_v48 = vsel %vm297_vm9, %v1616_v46, %v1613_v42  ;;  %v579_v46 = vld [vmem:[%s1785_s5] sm:$0x3] (%p88_p0) }
 0x615   : > { %v431_v59 = vpop.permute.xlu0 %430 }
 0x619   : > { %v451_v63 = vpop.permute.xlu0 %450 }
 0x61e   : > { %v1218_v55 = vpop.eup %1217 }
 0x61f   : > { %426 = vrot.lane.b32.xlu1 %v1218_v55, %s1311_s26  ;;  %v543_v55 = vpop.permute.xlu0 %542 }
 0x691   : > { %v427_v58 = vpop.permute.xlu1 %426 }
 0x692   : > { %v429_v60 = vmul.f32 %v427_v58, %v408_v44 }
 0x694   : > { %v433_v61 = vsel %vm297_vm9, %v429_v60, %v431_v59 }
 0x695   : > { %436 = vrot.lane.b32.xlu1 %v433_v61, %s1310_s25 }
 0x707   : > { %v437_v62 = vpop.permute.xlu1 %436 }
 0x708   : > { %439 = vst.msk [vmem:[#allocation2 + $0x8] sm:$0xff] %vm37_vm0, %v437_v62  ;;  %v453_v2 = vsel %vm37_vm0, %v437_v62, %v451_v63 }
 0x709   : > { %1092 = vmatmul.mubr.msk.f32.vlgmr.msra.gmra.mrb[2].mxu1 %vm190_vm7, %v453_v2 }
 0x70a   :  { %1101 = vmatprep.mubr.msk.f32.mxu1 (%p88_p0), %vm1313_vm11, %v1305_v3 }
 0x7dc   : > { %v529_v39 = vpop.f32.mrb[2].mxu1 }
 0x7dd   : > { %v530_v37 = vadd.f32 %v1552_v34, %v529_v39  ;;  %v1093_v40 = vpop.f32.mrb[3].mxu1 }
 0x7df   : > { %v971_v41 = vmul.f32 -1.442695, %v530_v37 }
 0x7e1   : > { %1219 = vpow2.f32 %v971_v41 }
 0x7e2   : > { %1221 = vtanh.f32 %v530_v37 }
 0x7eb   : > { %v1220_v44 = vpop.eup %1219 }
 0x7ec   : > { %v537_v45 = vadd.f32 1.0, %v1220_v44  ;;  %v1222_v38 = vpop.eup %1221 }
 0x7ee   : > { %1223 = vrcp.f32 %v537_v45 }
 0x7f8   : > { %v1224_v43 = vpop.eup %1223 }
 0x7f9   : > { %v540_v49 = vsel %vm1559_vm3, %v1222_v38, %v1224_v43 }
 0x7fa   : > { %547 = vrot.lane.b32.xlu1 %v540_v49, %s1311_s26  ;;  %v545_v56 = vmul.f32 %v543_v55, %v540_v49 }
 0x86c   : > { %v548_v53 = vpop.permute.xlu1 %547 }
 0x86d   : > { %v550_v54 = vmul.f32 %v548_v53, %v540_v49 }
 0x86f   : > { %552 = vrot.lane.b32.xlu1 %v550_v54, %s1310_s25 }
 0x873   : > { %562 = vrot.lane.b32.xlu1 %v446_v51, %s1312_s27 }
 0x877   : > { %441 = vrot.lane.b32.xlu1 %v434_v47, %s1312_s27 }
 0x8e1   : > { %v553_v57 = vpop.permute.xlu1 %552 }
 0x8e2   : > { %v555_v58 = vadd.f32 %v553_v57, %v545_v56 }
 0x8e4   : > { %1225 = vtanh.f32 %v555_v58  ;;  %v566_v59 = vsel %vm297_vm9, %v555_v58, %v543_v55 }
 0x8e5   : > { %v563_v60 = vpop.permute.xlu1 %562  ;;  %573 = vrot.lane.b32.xlu1 %v566_v59, %s1312_s27 }
 0x8e9   : > { %v442_v61 = vpop.permute.xlu1 %441 }
 0x8ea   : > { %444 = vst.msk [vmem:[#allocation3 + $0x8] sm:$0xff] %vm37_vm0, %v442_v61 }
 0x8ee   : > { %v1226_v51 = vpop.eup %1225 }
 0x8ef   : > { %558 = vrot.lane.b32.xlu0 %v1226_v51, %s1311_s26 }
 0x8f3   : > { %309 = vrot.lane.b32.xlu0 %v302_v48, %s1312_s27 }
 0x957   : > { %v574_v50 = vpop.permute.xlu1 %573 }
 0x958   : > { %576 = vst.msk [vmem:[#allocation3 + $0x10] sm:$0xff] %vm37_vm0, %v574_v50 }
 0x961   : > { %v559_v63 = vpop.permute.xlu0 %558 }
 0x962   : > { %v561_v62 = vmul.f32 %v559_v63, %v540_v49 }
 0x964   : > { %v565_v2 = vsel %vm297_vm9, %v561_v62, %v563_v60 }
 0x965   : > { %568 = vrot.lane.b32.xlu0 %v565_v2, %s1310_s25  ;;  %v310_v39 = vpop.permute.xlu0 %309  ;;  %s1227_s25 = scalar_lea.vmem (%p88_p0), %s911_s4, 32 }
 0x966   : > { %312 = vst.msk [vmem:[#allocation3] sm:$0xff] %vm37_vm0, %v310_v39  ;;  %p1228_p1 = scmp.ne.s32.totalorder (%p88_p0), %s911_s4, %s1227_s25  ;;  %p1233_p3 = scmp.lt.s32.totalorder (%p88_p0), %s1227_s25, %s1227_s25 }
 0x968   :  { %p1234_p4 = por (%p88_p0), %p1233_p3, %p1232_p2 }
 0x96a   :  { %p1235_p5 = pnand (%p88_p0), %p1234_p4, %p1228_p1 }
 0x9d2   :  { %90 = sbr.rel (!%p88_p0) target bundleno = 14 (0xe), region = 89 }
 0x9d7   : > { %v569_v37 = vpop.permute.xlu0 %568 }
 0x9d8   : > { %571 = vst.msk [vmem:[#allocation2 + $0x10] sm:$0xff] %vm37_vm0, %v569_v37 }
 0x9df   :  { %v578_v42 = vld [vmem:[#allocation2 + $0x10] sm:$0xff] }
 0x9e0   :  { %1095 = vmatpush3.msra.mxu0 %v578_v42  ;;  %1100 = vmatpush3.msra.mxu1 %v578_v42 }
 0x9e1   :  { %1097 = vmatmul.mubr.msk.f32.vlgmr.msra.gmra.mrb[0].mxu0 %vm580_vm10, %v579_v46  ;;  %1102 = vmatmul.mubr.msk.f32.vlgmr.msra.gmra.mrb[0].mxu1 %vm580_vm10, %v654_v52 }
 0x9e2   :  { %1168 = vmatprep.subr.bf16.mxu0 %v1314_v12  ;;  %1174 = vmatprep.subr.bf16.mxu1 %v1314_v12 }
 0x9e3   :  { %1170 = vmatpush3.bf16.msra.mxu0 %v1169_v4  ;;  %1176 = vmatpush3.bf16.msra.mxu1 %v1175_v8 }
 0x9e4   :  { %1171 = vmatprep.subr.bf16.mxu0 %v1314_v12  ;;  %1177 = vmatprep.subr.bf16.mxu1 %v1314_v12 }
 0x9e5   :  { %1112 = vmatprep.mubr.msk.f32.mxu0 %vm1313_vm11, %v1305_v3  ;;  %1123 = vmatprep.mubr.msk.f32.mxu1 %vm1313_vm11, %v1305_v3 }
 0x9e7   :  { %1173 = vmatpush3.bf16.msra.mxu0 %v1172_v13  ;;  %1179 = vmatpush3.bf16.msra.mxu1 %v1178_v14 }
 0xab4   :  { %v650_v15 = vpop.f32.mrb[0].mxu0  ;;  %v724_v16 = vpop.f32.mrb[0].mxu1 }
 0xab5   :  { %v1098_v17 = vpop.f32.mrb[1].mxu0  ;;  %v1103_v18 = vpop.f32.mrb[1].mxu1  ;;  %1113 = vmatmul.mubr.msk.f32.vlgmr.msra.gmra.mrb[2].mxu0 %vm37_vm0, %v724_v16  ;;  %1124 = vmatmul.mubr.msk.f32.vlgmr.msra.gmra.mrb[2].mxu1 %vm37_vm0, %v650_v15  ;;  %730 = vst.msk [vmem:[#allocation6] sm:$0x3] %vm728_vm12, %v724_v16  ;;  %729 = vst.msk [vmem:[#allocation4] sm:$0x3] %vm728_vm12, %v650_v15 }
 0xab6   :  { %1238 = shalt.err (!%p1235_p5)
}
 0xab7   :  { %s1239_s28 = scalar_lea.hbm %s1790_s10, 32 }
 0xab8   :  { %p1240_p6 = scmp.ne.s32.totalorder %s1790_s10, %s1239_s28  ;;  %p1243_p7 = scmp.lt.u32.totalorder %s1239_s28, %s1790_s10 }
 0xaba   :  { %p1245_p8 = pnand %p1243_p7, %p1240_p6 }
 0xabc   :  { %1248 = shalt.err (!%p1245_p8)
}
 0xabd   :  { %913 = dma.vmem_to_hbm [thread:$0]  %s911_s4, 32, %s1790_s10, [#allocation7]  }
 0xabe   :  { %s1249_s15 = scalar_lea.vmem %s901_s24, 32  ;;  %p1254_p10 = scmp.lt.s32.totalorder %s901_s24, %s901_s24 }
 0xabf   :  { %p1250_p9 = scmp.ne.s32.totalorder %s901_s24, %s1249_s15  ;;  %p1255_p11 = scmp.lt.s32.totalorder %s1249_s15, %s1249_s15 }
 0xac1   :  { %p1256_p12 = por %p1255_p11, %p1254_p10 }
 0xac3   :  { %p1257_p13 = pnand %p1256_p12, %p1250_p9 }
 0xac5   :  { %1260 = shalt.err (!%p1257_p13)
}
 0xac6   :  { %s1261_s16 = scalar_lea.hbm %s1789_s9, 32 }
 0xac7   :  { %p1262_p0 = scmp.ne.s32.totalorder %s1789_s9, %s1261_s16  ;;  %p1265_p1 = scmp.lt.u32.totalorder %s1261_s16, %s1789_s9 }
 0xac9   :  { %p1267_p2 = pnand %p1265_p1, %p1262_p0 }
 0xacb   :  { %1270 = shalt.err (!%p1267_p2)
}
 0xacc   :  { %903 = dma.vmem_to_hbm [thread:$0]  %s901_s24, 32, %s1789_s9, [#allocation5]   ;;  %v976_v20 = vld [vmem:[%s1788_s8] ss:$0 sm:$0xff] }
 0xacd   :  { %s1317_s3 = smov [#allocation8]  }
 0xace   :  { %s920_s1 = sshll.u32 %s1317_s3, 4  ;;  %s921_s1 = int_to_ptr.vmem [resolvable:$true] %s920_s1 }
 0xacf   :  { %s1271_s7 = scalar_lea.vmem %s921_s1, 32  ;;  %p1276_p4 = scmp.lt.s32.totalorder %s921_s1, %s921_s1 }
 0xad0   :  { %p1272_p3 = scmp.ne.s32.totalorder %s921_s1, %s1271_s7  ;;  %p1277_p5 = scmp.lt.s32.totalorder %s1271_s7, %s1271_s7 }
 0xad2   :  { %p1278_p6 = por %p1277_p5, %p1276_p4 }
 0xad4   :  { %p1279_p7 = pnand %p1278_p6, %p1272_p3 }
 0xb88   :  { %v808_v3 = vpop.f32.mrb[2].mxu0  ;;  %v881_v19 = vpop.f32.mrb[2].mxu1 }
 0xb89   :  { %v882_v21 = vadd.f32 %v881_v19, %v808_v3  ;;  %v1114_v22 = vpop.f32.mrb[3].mxu0  ;;  %v1125_v23 = vpop.f32.mrb[3].mxu1 }
 0xb8b   :  { %v892_v24 = vadd.f32 %v976_v20, %v882_v21 }
 0xb8d   :  { %893 = vst.msk [vmem:[#allocation8] sm:$0x3] %vm728_vm12, %v892_v24 }
 0xb8e   :  { %1282 = shalt.err (!%p1279_p7)
}
 0xb8f   :  { %s1283_s8 = scalar_lea.hbm %s1791_s11, 32 }
 0xb90   :  { %p1284_p8 = scmp.ne.s32.totalorder %s1791_s11, %s1283_s8  ;;  %p1287_p9 = scmp.lt.u32.totalorder %s1283_s8, %s1791_s11 }
 0xb92   :  { %p1289_p10 = pnand %p1287_p9, %p1284_p8 }
 0xb94   :  { %1292 = shalt.err (!%p1289_p10)
}
 0xb95   :  { %923 = dma.vmem_to_hbm [thread:$0]  %s921_s1, 32, %s1791_s11, [#allocation7]  }
 0xb96   :  { %1297 = dma.done.wait [#allocation5], 32  }
 0xb97   :  { %1298 = vsyncadd [#allocation5], 4294967264 }
 0xb98   :  { %1299 = dma.done.wait [#allocation7], 64  }
 0xb99   :  { %1300 = vsyncadd [#allocation7], 4294967232 }
 0xb9a   :  { %933 = vsyncpa [#allocation5], 1 }
 0xb9b   :  { %934 = vsyncpa [#allocation7], 1 }

</bundles_post_ra>
